<compile_context>
chip_gen: v5e
topology: v5e:2x2
jax: 0.10.0
libtpu: 0.0.40
codegen_flags: <defaults>
</compile_context>

<pallas_src>
import functools

import jax
import jax.numpy as jnp
from jax import lax
from jax.experimental import pallas as pl
from jax.experimental.pallas import tpu as pltpu


# ------------------------------ fused kernel -------------------------------- #

def _fused_attention_kernel(x_ref, wqkv_ref, wproj_ref, bproj_ref, o_ref,
                            o_acc, *, num_heads, scale):
    """One batch element: y = proj(softmax(q k^T * scale) v) for all heads."""
    N = x_ref.shape[1]
    C = x_ref.shape[2]
    H = num_heads
    Dh = C // H

    x = x_ref[0]                                                   # (N, C)

    # Fused qkv projection (qkv_bias=False -> no bias add).
    qkv = jnp.dot(x, wqkv_ref[...],
                  preferred_element_type=jnp.float32)              # (N, 3C) f32

    # Fold the softmax scale into q (N*C multiplies instead of N*N per head).
    q = qkv[:, 0 * C:1 * C] * scale                                # (N, C)
    k = qkv[:, 1 * C:2 * C]                                        # (N, C)
    v = qkv[:, 2 * C:3 * C]                                        # (N, C)

    # Per-head attention; H is static and small, so this unrolls fully.
    for h in range(H):
        lo, hi = h * Dh, (h + 1) * Dh
        qh = q[:, lo:hi]                                           # (N, Dh)
        kh = k[:, lo:hi]                                           # (N, Dh)
        vh = v[:, lo:hi]                                           # (N, Dh)

        # scores = qh @ kh^T, contracting last dims of both operands so no
        # explicit transpose of kh is materialized.
        s = lax.dot_general(qh, kh, (((1,), (1,)), ((), ())),
                            preferred_element_type=jnp.float32)    # (N, N)

        m = jnp.max(s, axis=-1, keepdims=True)                     # (N, 1)
        p = jnp.exp(s - m)                                         # (N, N)
        denom = jnp.sum(p, axis=-1, keepdims=True)                 # (N, 1)

        # PV matmul first, then normalize (N*Dh work) with the EUP reciprocal.
        oh = jnp.dot(p, vh, preferred_element_type=jnp.float32)    # (N, Dh)
        oh = oh * pl.reciprocal(denom, approx=True)

        # Merge heads lane-wise into the (N, C) accumulator scratch.
        o_acc[:, lo:hi] = oh

    # Output projection + bias, written as a lane-dense (N, C) slab.
    y = jnp.dot(o_acc[...], wproj_ref[...],
                preferred_element_type=jnp.float32) + bproj_ref[...]
    o_ref[0] = y.astype(o_ref.dtype)


def attention_forward(x, params, num_heads):
    """Equivalent of Attention.forward (comb=False, dropout disabled)."""
    B, N, C = x.shape
    assert C % num_heads == 0
    Dh = C // num_heads
    scale = Dh ** (-0.5)

    w_qkv = params["w_qkv"]                     # (C, 3C)
    w_proj = params["w_proj"]                   # (C, C)
    b_proj = params["b_proj"].reshape(1, C)     # (1, C)

    kern = functools.partial(_fused_attention_kernel,
                             num_heads=num_heads, scale=scale)

    cost = pl.CostEstimate(
        flops=2 * B * (N * C * 3 * C + 2 * num_heads * N * N * Dh + N * C * C),
        transcendentals=B * num_heads * N * N,
        bytes_accessed=4 * (2 * B * N * C + C * 3 * C + C * C + C),
    )

    return pl.pallas_call(
        kern,
        out_shape=jax.ShapeDtypeStruct((B, N, C), x.dtype),
        grid=(B,),
        in_specs=[
            pl.BlockSpec((1, N, C), lambda b: (b, 0, 0)),      # x: per-batch tile
            pl.BlockSpec((C, 3 * C), lambda b: (0, 0)),        # w_qkv: resident
            pl.BlockSpec((C, C), lambda b: (0, 0)),            # w_proj: resident
            pl.BlockSpec((1, C), lambda b: (0, 0)),            # b_proj: resident
        ],
        out_specs=pl.BlockSpec((1, N, C), lambda b: (b, 0, 0)),
        scratch_shapes=[pltpu.VMEM((N, C), jnp.float32)],      # head-merged acc
        compiler_params=pltpu.CompilerParams(
            dimension_semantics=("parallel",)),
        cost_estimate=cost,
    )(x, w_qkv, w_proj, b_proj)


# ------------------------------ params / reference --------------------------- #

def init_attention_params(key, dim):
    """Parameter shapes matching the module (qkv_bias=False -> no qkv bias)."""
    k1, k2, k3 = jax.random.split(key, 3)
    s = 1.0 / jnp.sqrt(dim)
    w_qkv = jax.random.uniform(k1, (dim, 3 * dim), jnp.float32, -s, s)
    w_proj = jax.random.uniform(k2, (dim, dim), jnp.float32, -s, s)
    b_proj = jax.random.uniform(k3, (dim,), jnp.float32, -s, s)
    return dict(w_qkv=w_qkv, w_proj=w_proj, b_proj=b_proj)


def attention_reference(x, params, num_heads):
    """Pure-JAX reference mirroring the PyTorch forward, for verification."""
    B, N, C = x.shape
    H = num_heads
    Dh = C // H
    scale = Dh ** (-0.5)
    qkv = x @ params["w_qkv"]
    qkv = qkv.reshape(B, N, 3, H, Dh).transpose(2, 0, 3, 1, 4)
    q, k, v = qkv[0], qkv[1], qkv[2]
    attn = jnp.einsum("bhnd,bhmd->bhnm", q, k) * scale
    attn = jax.nn.softmax(attn, axis=-1)
    o = jnp.einsum("bhnm,bhmd->bhnd", attn, v)
    o = o.transpose(0, 2, 1, 3).reshape(B, N, C)
    return o @ params["w_proj"] + params["b_proj"]


# ---------------------------------- main ------------------------------------- #

if __name__ == "__main__":
    B, N, C, H = 2, 8, 32, 8   # dim=32, num_heads=8 -> head_dim=4

    key = jax.random.PRNGKey(0)
    kx, kp = jax.random.split(key)
    x = jax.random.normal(kx, (B, N, C), jnp.float32)
    params = init_attention_params(kp, C)

    out = attention_forward(x, params, H)
    out = jax.block_until_ready(out)

    ref = attention_reference(x, params, H)
    assert out.shape == (B, N, C)
    # Slightly relaxed tolerance: softmax normalization uses the approximate
    # EUP reciprocal (pl.reciprocal(approx=True)); all other math is f32.
    assert jnp.allclose(out, ref, atol=3e-3, rtol=3e-3), "mismatch vs reference"

    print("KERNEL_OK")
</pallas_src>

<mosaic_0001>
module attributes {stable_mosaic.version = 11 : i64} {
  func.func @_fused_attention_kernel(%arg0: i32, %arg1: memref<1x8x32xf32, #tpu.memory_space<vmem>>, %arg2: memref<32x96xf32, #tpu.memory_space<vmem>>, %arg3: memref<32x32xf32, #tpu.memory_space<vmem>>, %arg4: memref<1x32xf32, #tpu.memory_space<vmem>>, %arg5: memref<1x8x32xf32, #tpu.memory_space<vmem>>, %arg6: memref<8x32xf32, #tpu.memory_space<vmem>>) attributes {dimension_semantics = [#tpu.dimension_semantics<parallel>], iteration_bounds = array<i64: 2>, scalar_prefetch = 0 : i64, scratch_operands = 1 : i64, tpu.core_type = #tpu.core_type<tc>, window_params = [{transform_indices = @transform_0, window_bounds = array<i64: 1, 8, 32>}, {pipeline_mode = #tpu.pipeline_mode<synchronous>, transform_indices = @transform_1, window_bounds = array<i64: 32, 96>}, {pipeline_mode = #tpu.pipeline_mode<synchronous>, transform_indices = @transform_2, window_bounds = array<i64: 32, 32>}, {pipeline_mode = #tpu.pipeline_mode<synchronous>, transform_indices = @transform_3, window_bounds = array<i64: 1, 32>}, {transform_indices = @transform_4, window_bounds = array<i64: 1, 8, 32>}]} {
    %c0 = arith.constant 0 : index
    %c0_0 = arith.constant 0 : index
    %c0_1 = arith.constant 0 : index
    %0 = vector.load %arg1[%c0, %c0_0, %c0_1] : memref<1x8x32xf32, #tpu.memory_space<vmem>>, vector<1x8x32xf32>
    %1 = vector.shape_cast %0 : vector<1x8x32xf32> to vector<8x32xf32>
    %c0_2 = arith.constant 0 : index
    %c0_3 = arith.constant 0 : index
    %2 = vector.load %arg2[%c0_2, %c0_3] : memref<32x96xf32, #tpu.memory_space<vmem>>, vector<32x96xf32>
    %cst = arith.constant dense<0.000000e+00> : vector<8x96xf32>
    %3 = tpu.matmul %1, %2, %cst {dimension_numbers = #tpu.dot_dimension_numbers<[1], [0], [0], [1], [0, 0, 1, 1], [], []>} : vector<8x32xf32>, vector<32x96xf32>, vector<8x96xf32> -> vector<8x96xf32>
    %4 = vector.extract_strided_slice %3 {offsets = [0, 0], sizes = [8, 32], strides = [1, 1]} : vector<8x96xf32> to vector<8x32xf32>
    %cst_4 = arith.constant 5.000000e-01 : f32
    %5 = vector.broadcast %cst_4 : f32 to vector<8x32xf32>
    %6 = arith.mulf %4, %5 : vector<8x32xf32>
    %7 = vector.extract_strided_slice %3 {offsets = [0, 32], sizes = [8, 32], strides = [1, 1]} : vector<8x96xf32> to vector<8x32xf32>
    %8 = vector.extract_strided_slice %3 {offsets = [0, 64], sizes = [8, 32], strides = [1, 1]} : vector<8x96xf32> to vector<8x32xf32>
    %9 = vector.extract_strided_slice %6 {offsets = [0, 0], sizes = [8, 4], strides = [1, 1]} : vector<8x32xf32> to vector<8x4xf32>
    %10 = vector.extract_strided_slice %7 {offsets = [0, 0], sizes = [8, 4], strides = [1, 1]} : vector<8x32xf32> to vector<8x4xf32>
    %11 = vector.extract_strided_slice %8 {offsets = [0, 0], sizes = [8, 4], strides = [1, 1]} : vector<8x32xf32> to vector<8x4xf32>
    %cst_5 = arith.constant dense<0.000000e+00> : vector<8x8xf32>
    %12 = tpu.matmul %9, %10, %cst_5 {dimension_numbers = #tpu.dot_dimension_numbers<[1], [1], [0], [0], [0, 0, 1, 0], [], []>} : vector<8x4xf32>, vector<8x4xf32>, vector<8x8xf32> -> vector<8x8xf32>
    %cst_6 = arith.constant dense<0xFF800000> : vector<8xf32>
    %13 = vector.multi_reduction <maximumf>, %12, %cst_6 [1] : vector<8x8xf32> to vector<8xf32>
    %14 = vector.shape_cast %13 : vector<8xf32> to vector<8x1xf32>
    %15 = vector.broadcast %14 : vector<8x1xf32> to vector<8x8xf32>
    %16 = arith.subf %12, %15 : vector<8x8xf32>
    %17 = math.exp %16 : vector<8x8xf32>
    %cst_7 = arith.constant dense<0.000000e+00> : vector<8xf32>
    %18 = vector.multi_reduction <add>, %17, %cst_7 [1] : vector<8x8xf32> to vector<8xf32>
    %19 = vector.shape_cast %18 : vector<8xf32> to vector<8x1xf32>
    %cst_8 = arith.constant dense<0.000000e+00> : vector<8x4xf32>
    %20 = tpu.matmul %17, %11, %cst_8 {dimension_numbers = #tpu.dot_dimension_numbers<[1], [0], [0], [1], [0, 0, 1, 1], [], []>} : vector<8x8xf32>, vector<8x4xf32>, vector<8x4xf32> -> vector<8x4xf32>
    %21 = tpu.reciprocal %19 {approx = true} : vector<8x1xf32> -> vector<8x1xf32>
    %22 = vector.broadcast %21 : vector<8x1xf32> to vector<8x4xf32>
    %23 = arith.mulf %20, %22 : vector<8x4xf32>
    %c0_9 = arith.constant 0 : index
    %c0_10 = arith.constant 0 : index
    %24 = vector.load %arg6[%c0_9, %c0_10] : memref<8x32xf32, #tpu.memory_space<vmem>>, vector<8x4xf32>
    tpu.vector_store %arg6[%c0_9, %c0_10], %23 {strides = array<i32>} : memref<8x32xf32, #tpu.memory_space<vmem>>, vector<8x4xf32>,
    %25 = vector.extract_strided_slice %6 {offsets = [0, 4], sizes = [8, 4], strides = [1, 1]} : vector<8x32xf32> to vector<8x4xf32>
    %26 = vector.extract_strided_slice %7 {offsets = [0, 4], sizes = [8, 4], strides = [1, 1]} : vector<8x32xf32> to vector<8x4xf32>
    %27 = vector.extract_strided_slice %8 {offsets = [0, 4], sizes = [8, 4], strides = [1, 1]} : vector<8x32xf32> to vector<8x4xf32>
    %cst_11 = arith.constant dense<0.000000e+00> : vector<8x8xf32>
    %28 = tpu.matmul %25, %26, %cst_11 {dimension_numbers = #tpu.dot_dimension_numbers<[1], [1], [0], [0], [0, 0, 1, 0], [], []>} : vector<8x4xf32>, vector<8x4xf32>, vector<8x8xf32> -> vector<8x8xf32>
    %cst_12 = arith.constant dense<0xFF800000> : vector<8xf32>
    %29 = vector.multi_reduction <maximumf>, %28, %cst_12 [1] : vector<8x8xf32> to vector<8xf32>
    %30 = vector.shape_cast %29 : vector<8xf32> to vector<8x1xf32>
    %31 = vector.broadcast %30 : vector<8x1xf32> to vector<8x8xf32>
    %32 = arith.subf %28, %31 : vector<8x8xf32>
    %33 = math.exp %32 : vector<8x8xf32>
    %cst_13 = arith.constant dense<0.000000e+00> : vector<8xf32>
    %34 = vector.multi_reduction <add>, %33, %cst_13 [1] : vector<8x8xf32> to vector<8xf32>
    %35 = vector.shape_cast %34 : vector<8xf32> to vector<8x1xf32>
    %cst_14 = arith.constant dense<0.000000e+00> : vector<8x4xf32>
    %36 = tpu.matmul %33, %27, %cst_14 {dimension_numbers = #tpu.dot_dimension_numbers<[1], [0], [0], [1], [0, 0, 1, 1], [], []>} : vector<8x8xf32>, vector<8x4xf32>, vector<8x4xf32> -> vector<8x4xf32>
    %37 = tpu.reciprocal %35 {approx = true} : vector<8x1xf32> -> vector<8x1xf32>
    %38 = vector.broadcast %37 : vector<8x1xf32> to vector<8x4xf32>
    %39 = arith.mulf %36, %38 : vector<8x4xf32>
    %c0_15 = arith.constant 0 : index
    %c4 = arith.constant 4 : index
    %40 = vector.load %arg6[%c0_15, %c4] : memref<8x32xf32, #tpu.memory_space<vmem>>, vector<8x4xf32>
    tpu.vector_store %arg6[%c0_15, %c4], %39 {strides = array<i32>} : memref<8x32xf32, #tpu.memory_space<vmem>>, vector<8x4xf32>,
    %41 = vector.extract_strided_slice %6 {offsets = [0, 8], sizes = [8, 4], strides = [1, 1]} : vector<8x32xf32> to vector<8x4xf32>
    %42 = vector.extract_strided_slice %7 {offsets = [0, 8], sizes = [8, 4], strides = [1, 1]} : vector<8x32xf32> to vector<8x4xf32>
    %43 = vector.extract_strided_slice %8 {offsets = [0, 8], sizes = [8, 4], strides = [1, 1]} : vector<8x32xf32> to vector<8x4xf32>
    %cst_16 = arith.constant dense<0.000000e+00> : vector<8x8xf32>
    %44 = tpu.matmul %41, %42, %cst_16 {dimension_numbers = #tpu.dot_dimension_numbers<[1], [1], [0], [0], [0, 0, 1, 0], [], []>} : vector<8x4xf32>, vector<8x4xf32>, vector<8x8xf32> -> vector<8x8xf32>
    %cst_17 = arith.constant dense<0xFF800000> : vector<8xf32>
    %45 = vector.multi_reduction <maximumf>, %44, %cst_17 [1] : vector<8x8xf32> to vector<8xf32>
    %46 = vector.shape_cast %45 : vector<8xf32> to vector<8x1xf32>
    %47 = vector.broadcast %46 : vector<8x1xf32> to vector<8x8xf32>
    %48 = arith.subf %44, %47 : vector<8x8xf32>
    %49 = math.exp %48 : vector<8x8xf32>
    %cst_18 = arith.constant dense<0.000000e+00> : vector<8xf32>
    %50 = vector.multi_reduction <add>, %49, %cst_18 [1] : vector<8x8xf32> to vector<8xf32>
    %51 = vector.shape_cast %50 : vector<8xf32> to vector<8x1xf32>
    %cst_19 = arith.constant dense<0.000000e+00> : vector<8x4xf32>
    %52 = tpu.matmul %49, %43, %cst_19 {dimension_numbers = #tpu.dot_dimension_numbers<[1], [0], [0], [1], [0, 0, 1, 1], [], []>} : vector<8x8xf32>, vector<8x4xf32>, vector<8x4xf32> -> vector<8x4xf32>
    %53 = tpu.reciprocal %51 {approx = true} : vector<8x1xf32> -> vector<8x1xf32>
    %54 = vector.broadcast %53 : vector<8x1xf32> to vector<8x4xf32>
    %55 = arith.mulf %52, %54 : vector<8x4xf32>
    %c0_20 = arith.constant 0 : index
    %c8 = arith.constant 8 : index
    %56 = vector.load %arg6[%c0_20, %c8] : memref<8x32xf32, #tpu.memory_space<vmem>>, vector<8x4xf32>
    tpu.vector_store %arg6[%c0_20, %c8], %55 {strides = array<i32>} : memref<8x32xf32, #tpu.memory_space<vmem>>, vector<8x4xf32>,
    %57 = vector.extract_strided_slice %6 {offsets = [0, 12], sizes = [8, 4], strides = [1, 1]} : vector<8x32xf32> to vector<8x4xf32>
    %58 = vector.extract_strided_slice %7 {offsets = [0, 12], sizes = [8, 4], strides = [1, 1]} : vector<8x32xf32> to vector<8x4xf32>
    %59 = vector.extract_strided_slice %8 {offsets = [0, 12], sizes = [8, 4], strides = [1, 1]} : vector<8x32xf32> to vector<8x4xf32>
    %cst_21 = arith.constant dense<0.000000e+00> : vector<8x8xf32>
    %60 = tpu.matmul %57, %58, %cst_21 {dimension_numbers = #tpu.dot_dimension_numbers<[1], [1], [0], [0], [0, 0, 1, 0], [], []>} : vector<8x4xf32>, vector<8x4xf32>, vector<8x8xf32> -> vector<8x8xf32>
    %cst_22 = arith.constant dense<0xFF800000> : vector<8xf32>
    %61 = vector.multi_reduction <maximumf>, %60, %cst_22 [1] : vector<8x8xf32> to vector<8xf32>
    %62 = vector.shape_cast %61 : vector<8xf32> to vector<8x1xf32>
    %63 = vector.broadcast %62 : vector<8x1xf32> to vector<8x8xf32>
    %64 = arith.subf %60, %63 : vector<8x8xf32>
    %65 = math.exp %64 : vector<8x8xf32>
    %cst_23 = arith.constant dense<0.000000e+00> : vector<8xf32>
    %66 = vector.multi_reduction <add>, %65, %cst_23 [1] : vector<8x8xf32> to vector<8xf32>
    %67 = vector.shape_cast %66 : vector<8xf32> to vector<8x1xf32>
    %cst_24 = arith.constant dense<0.000000e+00> : vector<8x4xf32>
    %68 = tpu.matmul %65, %59, %cst_24 {dimension_numbers = #tpu.dot_dimension_numbers<[1], [0], [0], [1], [0, 0, 1, 1], [], []>} : vector<8x8xf32>, vector<8x4xf32>, vector<8x4xf32> -> vector<8x4xf32>
    %69 = tpu.reciprocal %67 {approx = true} : vector<8x1xf32> -> vector<8x1xf32>
    %70 = vector.broadcast %69 : vector<8x1xf32> to vector<8x4xf32>
    %71 = arith.mulf %68, %70 : vector<8x4xf32>
    %c0_25 = arith.constant 0 : index
    %c12 = arith.constant 12 : index
    %72 = vector.load %arg6[%c0_25, %c12] : memref<8x32xf32, #tpu.memory_space<vmem>>, vector<8x4xf32>
    tpu.vector_store %arg6[%c0_25, %c12], %71 {strides = array<i32>} : memref<8x32xf32, #tpu.memory_space<vmem>>, vector<8x4xf32>,
    %73 = vector.extract_strided_slice %6 {offsets = [0, 16], sizes = [8, 4], strides = [1, 1]} : vector<8x32xf32> to vector<8x4xf32>
    %74 = vector.extract_strided_slice %7 {offsets = [0, 16], sizes = [8, 4], strides = [1, 1]} : vector<8x32xf32> to vector<8x4xf32>
    %75 = vector.extract_strided_slice %8 {offsets = [0, 16], sizes = [8, 4], strides = [1, 1]} : vector<8x32xf32> to vector<8x4xf32>
    %cst_26 = arith.constant dense<0.000000e+00> : vector<8x8xf32>
    %76 = tpu.matmul %73, %74, %cst_26 {dimension_numbers = #tpu.dot_dimension_numbers<[1], [1], [0], [0], [0, 0, 1, 0], [], []>} : vector<8x4xf32>, vector<8x4xf32>, vector<8x8xf32> -> vector<8x8xf32>
    %cst_27 = arith.constant dense<0xFF800000> : vector<8xf32>
    %77 = vector.multi_reduction <maximumf>, %76, %cst_27 [1] : vector<8x8xf32> to vector<8xf32>
    %78 = vector.shape_cast %77 : vector<8xf32> to vector<8x1xf32>
    %79 = vector.broadcast %78 : vector<8x1xf32> to vector<8x8xf32>
    %80 = arith.subf %76, %79 : vector<8x8xf32>
    %81 = math.exp %80 : vector<8x8xf32>
    %cst_28 = arith.constant dense<0.000000e+00> : vector<8xf32>
    %82 = vector.multi_reduction <add>, %81, %cst_28 [1] : vector<8x8xf32> to vector<8xf32>
    %83 = vector.shape_cast %82 : vector<8xf32> to vector<8x1xf32>
    %cst_29 = arith.constant dense<0.000000e+00> : vector<8x4xf32>
    %84 = tpu.matmul %81, %75, %cst_29 {dimension_numbers = #tpu.dot_dimension_numbers<[1], [0], [0], [1], [0, 0, 1, 1], [], []>} : vector<8x8xf32>, vector<8x4xf32>, vector<8x4xf32> -> vector<8x4xf32>
    %85 = tpu.reciprocal %83 {approx = true} : vector<8x1xf32> -> vector<8x1xf32>
    %86 = vector.broadcast %85 : vector<8x1xf32> to vector<8x4xf32>
    %87 = arith.mulf %84, %86 : vector<8x4xf32>
    %c0_30 = arith.constant 0 : index
    %c16 = arith.constant 16 : index
    %88 = vector.load %arg6[%c0_30, %c16] : memref<8x32xf32, #tpu.memory_space<vmem>>, vector<8x4xf32>
    tpu.vector_store %arg6[%c0_30, %c16], %87 {strides = array<i32>} : memref<8x32xf32, #tpu.memory_space<vmem>>, vector<8x4xf32>,
    %89 = vector.extract_strided_slice %6 {offsets = [0, 20], sizes = [8, 4], strides = [1, 1]} : vector<8x32xf32> to vector<8x4xf32>
    %90 = vector.extract_strided_slice %7 {offsets = [0, 20], sizes = [8, 4], strides = [1, 1]} : vector<8x32xf32> to vector<8x4xf32>
    %91 = vector.extract_strided_slice %8 {offsets = [0, 20], sizes = [8, 4], strides = [1, 1]} : vector<8x32xf32> to vector<8x4xf32>
    %cst_31 = arith.constant dense<0.000000e+00> : vector<8x8xf32>
    %92 = tpu.matmul %89, %90, %cst_31 {dimension_numbers = #tpu.dot_dimension_numbers<[1], [1], [0], [0], [0, 0, 1, 0], [], []>} : vector<8x4xf32>, vector<8x4xf32>, vector<8x8xf32> -> vector<8x8xf32>
    %cst_32 = arith.constant dense<0xFF800000> : vector<8xf32>
    %93 = vector.multi_reduction <maximumf>, %92, %cst_32 [1] : vector<8x8xf32> to vector<8xf32>
    %94 = vector.shape_cast %93 : vector<8xf32> to vector<8x1xf32>
    %95 = vector.broadcast %94 : vector<8x1xf32> to vector<8x8xf32>
    %96 = arith.subf %92, %95 : vector<8x8xf32>
    %97 = math.exp %96 : vector<8x8xf32>
    %cst_33 = arith.constant dense<0.000000e+00> : vector<8xf32>
    %98 = vector.multi_reduction <add>, %97, %cst_33 [1] : vector<8x8xf32> to vector<8xf32>
    %99 = vector.shape_cast %98 : vector<8xf32> to vector<8x1xf32>
    %cst_34 = arith.constant dense<0.000000e+00> : vector<8x4xf32>
    %100 = tpu.matmul %97, %91, %cst_34 {dimension_numbers = #tpu.dot_dimension_numbers<[1], [0], [0], [1], [0, 0, 1, 1], [], []>} : vector<8x8xf32>, vector<8x4xf32>, vector<8x4xf32> -> vector<8x4xf32>
    %101 = tpu.reciprocal %99 {approx = true} : vector<8x1xf32> -> vector<8x1xf32>
    %102 = vector.broadcast %101 : vector<8x1xf32> to vector<8x4xf32>
    %103 = arith.mulf %100, %102 : vector<8x4xf32>
    %c0_35 = arith.constant 0 : index
    %c20 = arith.constant 20 : index
    %104 = vector.load %arg6[%c0_35, %c20] : memref<8x32xf32, #tpu.memory_space<vmem>>, vector<8x4xf32>
    tpu.vector_store %arg6[%c0_35, %c20], %103 {strides = array<i32>} : memref<8x32xf32, #tpu.memory_space<vmem>>, vector<8x4xf32>,
    %105 = vector.extract_strided_slice %6 {offsets = [0, 24], sizes = [8, 4], strides = [1, 1]} : vector<8x32xf32> to vector<8x4xf32>
    %106 = vector.extract_strided_slice %7 {offsets = [0, 24], sizes = [8, 4], strides = [1, 1]} : vector<8x32xf32> to vector<8x4xf32>
    %107 = vector.extract_strided_slice %8 {offsets = [0, 24], sizes = [8, 4], strides = [1, 1]} : vector<8x32xf32> to vector<8x4xf32>
    %cst_36 = arith.constant dense<0.000000e+00> : vector<8x8xf32>
    %108 = tpu.matmul %105, %106, %cst_36 {dimension_numbers = #tpu.dot_dimension_numbers<[1], [1], [0], [0], [0, 0, 1, 0], [], []>} : vector<8x4xf32>, vector<8x4xf32>, vector<8x8xf32> -> vector<8x8xf32>
    %cst_37 = arith.constant dense<0xFF800000> : vector<8xf32>
    %109 = vector.multi_reduction <maximumf>, %108, %cst_37 [1] : vector<8x8xf32> to vector<8xf32>
    %110 = vector.shape_cast %109 : vector<8xf32> to vector<8x1xf32>
    %111 = vector.broadcast %110 : vector<8x1xf32> to vector<8x8xf32>
    %112 = arith.subf %108, %111 : vector<8x8xf32>
    %113 = math.exp %112 : vector<8x8xf32>
    %cst_38 = arith.constant dense<0.000000e+00> : vector<8xf32>
    %114 = vector.multi_reduction <add>, %113, %cst_38 [1] : vector<8x8xf32> to vector<8xf32>
    %115 = vector.shape_cast %114 : vector<8xf32> to vector<8x1xf32>
    %cst_39 = arith.constant dense<0.000000e+00> : vector<8x4xf32>
    %116 = tpu.matmul %113, %107, %cst_39 {dimension_numbers = #tpu.dot_dimension_numbers<[1], [0], [0], [1], [0, 0, 1, 1], [], []>} : vector<8x8xf32>, vector<8x4xf32>, vector<8x4xf32> -> vector<8x4xf32>
    %117 = tpu.reciprocal %115 {approx = true} : vector<8x1xf32> -> vector<8x1xf32>
    %118 = vector.broadcast %117 : vector<8x1xf32> to vector<8x4xf32>
    %119 = arith.mulf %116, %118 : vector<8x4xf32>
    %c0_40 = arith.constant 0 : index
    %c24 = arith.constant 24 : index
    %120 = vector.load %arg6[%c0_40, %c24] : memref<8x32xf32, #tpu.memory_space<vmem>>, vector<8x4xf32>
    tpu.vector_store %arg6[%c0_40, %c24], %119 {strides = array<i32>} : memref<8x32xf32, #tpu.memory_space<vmem>>, vector<8x4xf32>,
    %121 = vector.extract_strided_slice %6 {offsets = [0, 28], sizes = [8, 4], strides = [1, 1]} : vector<8x32xf32> to vector<8x4xf32>
    %122 = vector.extract_strided_slice %7 {offsets = [0, 28], sizes = [8, 4], strides = [1, 1]} : vector<8x32xf32> to vector<8x4xf32>
    %123 = vector.extract_strided_slice %8 {offsets = [0, 28], sizes = [8, 4], strides = [1, 1]} : vector<8x32xf32> to vector<8x4xf32>
    %cst_41 = arith.constant dense<0.000000e+00> : vector<8x8xf32>
    %124 = tpu.matmul %121, %122, %cst_41 {dimension_numbers = #tpu.dot_dimension_numbers<[1], [1], [0], [0], [0, 0, 1, 0], [], []>} : vector<8x4xf32>, vector<8x4xf32>, vector<8x8xf32> -> vector<8x8xf32>
    %cst_42 = arith.constant dense<0xFF800000> : vector<8xf32>
    %125 = vector.multi_reduction <maximumf>, %124, %cst_42 [1] : vector<8x8xf32> to vector<8xf32>
    %126 = vector.shape_cast %125 : vector<8xf32> to vector<8x1xf32>
    %127 = vector.broadcast %126 : vector<8x1xf32> to vector<8x8xf32>
    %128 = arith.subf %124, %127 : vector<8x8xf32>
    %129 = math.exp %128 : vector<8x8xf32>
    %cst_43 = arith.constant dense<0.000000e+00> : vector<8xf32>
    %130 = vector.multi_reduction <add>, %129, %cst_43 [1] : vector<8x8xf32> to vector<8xf32>
    %131 = vector.shape_cast %130 : vector<8xf32> to vector<8x1xf32>
    %cst_44 = arith.constant dense<0.000000e+00> : vector<8x4xf32>
    %132 = tpu.matmul %129, %123, %cst_44 {dimension_numbers = #tpu.dot_dimension_numbers<[1], [0], [0], [1], [0, 0, 1, 1], [], []>} : vector<8x8xf32>, vector<8x4xf32>, vector<8x4xf32> -> vector<8x4xf32>
    %133 = tpu.reciprocal %131 {approx = true} : vector<8x1xf32> -> vector<8x1xf32>
    %134 = vector.broadcast %133 : vector<8x1xf32> to vector<8x4xf32>
    %135 = arith.mulf %132, %134 : vector<8x4xf32>
    %c0_45 = arith.constant 0 : index
    %c28 = arith.constant 28 : index
    %136 = vector.load %arg6[%c0_45, %c28] : memref<8x32xf32, #tpu.memory_space<vmem>>, vector<8x4xf32>
    tpu.vector_store %arg6[%c0_45, %c28], %135 {strides = array<i32>} : memref<8x32xf32, #tpu.memory_space<vmem>>, vector<8x4xf32>,
    %c0_46 = arith.constant 0 : index
    %c0_47 = arith.constant 0 : index
    %137 = vector.load %arg6[%c0_46, %c0_47] : memref<8x32xf32, #tpu.memory_space<vmem>>, vector<8x32xf32>
    %c0_48 = arith.constant 0 : index
    %c0_49 = arith.constant 0 : index
    %138 = vector.load %arg3[%c0_48, %c0_49] : memref<32x32xf32, #tpu.memory_space<vmem>>, vector<32x32xf32>
    %cst_50 = arith.constant dense<0.000000e+00> : vector<8x32xf32>
    %139 = tpu.matmul %137, %138, %cst_50 {dimension_numbers = #tpu.dot_dimension_numbers<[1], [0], [0], [1], [0, 0, 1, 1], [], []>} : vector<8x32xf32>, vector<32x32xf32>, vector<8x32xf32> -> vector<8x32xf32>
    %c0_51 = arith.constant 0 : index
    %c0_52 = arith.constant 0 : index
    %140 = vector.load %arg4[%c0_51, %c0_52] : memref<1x32xf32, #tpu.memory_space<vmem>>, vector<1x32xf32>
    %141 = vector.broadcast %140 : vector<1x32xf32> to vector<8x32xf32>
    %142 = arith.addf %139, %141 : vector<8x32xf32>
    %c0_53 = arith.constant 0 : index
    %c0_54 = arith.constant 0 : index
    %c0_55 = arith.constant 0 : index
    %143 = vector.load %arg5[%c0_53, %c0_54, %c0_55] : memref<1x8x32xf32, #tpu.memory_space<vmem>>, vector<1x8x32xf32>
    %144 = vector.shape_cast %143 : vector<1x8x32xf32> to vector<8x32xf32>
    %145 = vector.shape_cast %142 : vector<8x32xf32> to vector<1x8x32xf32>
    tpu.vector_store %arg5[%c0_53, %c0_54, %c0_55], %145 {strides = array<i32>} : memref<1x8x32xf32, #tpu.memory_space<vmem>>, vector<1x8x32xf32>,
    return
  }
  func.func @transform_0(%arg0: i32) -> (i32, i32, i32) {
    %c0_i32 = arith.constant 0 : i32
    %c0_i32_0 = arith.constant 0 : i32
    %c0_i32_1 = arith.constant 0 : i32
    return %arg0, %c0_i32, %c0_i32_0 : i32, i32, i32
  }
  func.func @transform_1(%arg0: i32) -> (i32, i32) {
    %c0_i32 = arith.constant 0 : i32
    %c0_i32_0 = arith.constant 0 : i32
    %c0_i32_1 = arith.constant 0 : i32
    return %c0_i32, %c0_i32_0 : i32, i32
  }
  func.func @transform_2(%arg0: i32) -> (i32, i32) {
    %c0_i32 = arith.constant 0 : i32
    %c0_i32_0 = arith.constant 0 : i32
    %c0_i32_1 = arith.constant 0 : i32
    return %c0_i32, %c0_i32_0 : i32, i32
  }
  func.func @transform_3(%arg0: i32) -> (i32, i32) {
    %c0_i32 = arith.constant 0 : i32
    %c0_i32_0 = arith.constant 0 : i32
    %c0_i32_1 = arith.constant 0 : i32
    return %c0_i32, %c0_i32_0 : i32, i32
  }
  func.func @transform_4(%arg0: i32) -> (i32, i32, i32) {
    %c0_i32 = arith.constant 0 : i32
    %c0_i32_0 = arith.constant 0 : i32
    %c0_i32_1 = arith.constant 0 : i32
    return %arg0, %c0_i32, %c0_i32_0 : i32, i32, i32
  }
}

</mosaic_0001>

<bundles_post_ra>
// kernel: tpu_custom_call.1
= control target key start
LH: loop header
LB: loop body
LE: loop exit
PB: predicated region body
PF: predicated region fallthrough
CT: control target
= control target key end

     0   :  { %9 = vsyncpa [#allocation4], 0  ;;  %s1603_s0 = inlined_call_operand.hbm [shape: f32[2,8,32], index: 0, kind: input, shape index: {}]   ;;  %s1604_s1 = inlined_call_operand.hbm [shape: f32[32,96], index: 1, kind: input, shape index: {}]   ;;  %s1605_s2 = inlined_call_operand.hbm [shape: f32[32,32], index: 2, kind: input, shape index: {}]   ;;  %s1606_s3 = inlined_call_operand.vmem [shape: f32[1,32], index: 3, kind: input, shape index: {}]   ;;  %s1607_s4 = inlined_call_operand.hbm [shape: f32[2,8,32], index: 4, kind: output, shape index: {}]  }
   0x1   :  { %11 = vsyncpa [#allocation4 + $0x1], 0 }
   0x2   :  { %12 = vsyncpa [#allocation7], 0 }
   0x3   :  { %13 = vsyncpa [#allocation5], 0 }
   0x4   :  { %15 = vsyncpa [#allocation5 + $0x1], 0  ;;  %s1376_s15 = smov 0   ;;  %s1378_s16 = smov 0  }
   0x5   :  { %s1380_s17 = smov 0   ;;  %s1382_s18 = smov 0  }
   0x6 LB: > { %s152_s21 = sshll.u32 %s1604_s1, 4  ;;  %s1400_s22 = sadd.s32 4294967295, %s1315_s18   ;;  %s1315_s18 = sphi %s1382_s18, %s1618_s18   ;;  %s1311_s17 = sphi %s1380_s17, %s1617_s17   ;;  %s1307_s16 = sphi %s1378_s16, %s1616_s16   ;;  %s1303_s15 = sphi %s1376_s15, %s1615_s15   ;;  %s153_s21 = int_to_ptr.hbm [resolvable:$true] %s152_s21 }
   0x7   : > { %p982_p0 = scmp.ge.s32.totalorder %s1315_s18, 1  ;;  %p42_p1 = scmp.eq.s32.totalorder %s1400_s22, 0 }
   0x8   : > { %p141_p2 = scmp.lt.s32.totalorder %s1315_s18, 3  ;;  %s1317_s24 = smov [#allocation6]  }
   0x9   : > { %s154_s25 = sshll.u32 %s1317_s24, 4  ;;  %s166_s28 = sshll.u32 %s1605_s2, 4  ;;  %s155_s25 = int_to_ptr.vmem [resolvable:$true] %s154_s25  ;;  %s167_s28 = int_to_ptr.hbm [resolvable:$true] %s166_s28 }
   0xa   : > { %p1405_p3 = pnand %p982_p0, %p141_p2  ;;  %s1318_s29 = smov [#allocation8]  }
   0xb   : > { %s168_s30 = sshll.u32 %s1318_s29, 4  ;;  %s1319_s5 = smov 128   ;;  %s169_s30 = int_to_ptr.vmem [resolvable:$true] %s168_s30 }
   0xc   : > { %p1035_p4 = pneg %p1405_p3  ;;  %s1320_s6 = smov 8  }
   0xd   : > { %s981_s7 = sadd.s32 4294967294, %s1315_s18   ;;  %s1419_s8 = sadd.s32 1, %s1315_s18  }
   0xe   : > { %p1036_p6 = pnand %p1035_p4, %p42_p1  ;;  %s25_s9 = ssub.s32 %s1315_s18, %s1419_s8 }
   0xf   : > { %s28_s10 = sadd.s32 1, %s1311_s17  ;;  %p26_p7 = scmp.eq.s32.totalorder %s25_s9, 0 }
  0x10   : > { %1038 = dma.hbm_to_vmem [thread:$0]  (!%p1036_p6), %s153_s21, 512, %s155_s25, [#allocation7], %s1319_s5, %s1319_s5, %s1320_s6  }
  0x11   : > { %1041 = dma.hbm_to_vmem [thread:$0]  (!%p1036_p6), %s167_s28, 512, %s169_s30, [#allocation7], %s1319_s5, %s1319_s5, %s1320_s6  }
  0x12   : > { %p35_p8 = scmp.ne.s32.totalorder %s1311_s17, %s1307_s16  ;;  %p36_p9 = scmp.eq.s32.totalorder %s1315_s18, 0 }
  0x13   : > { %p41_p10 = scmp.ne.s32.totalorder %s1307_s16, %s1303_s15  ;;  %p128_p13 = scmp.eq.s32.totalorder %s1400_s22, 1 }
  0x14   : > { %s1430_s11 = scalar_select %p26_p7, %s1311_s17, %s28_s10  }
  0x15   : > { %p1432_p11 = por %p36_p9, %p35_p8  ;;  %p1438_p12 = por %p42_p1, %p41_p10 }
  0x16   : > { %p134_p0 = scmp.eq.s32.totalorder %s981_s7, 1  ;;  %p1052_p2 = scmp.lt.s32.totalorder %s1315_s18, 2 }
  0x17   : > { %s185_s14 = sand.u32 1, %s1311_s17   ;;  %p1445_p4 = por %p128_p13, %p35_p8 }
  0x18   : > { %p1449_p6 = por %p134_p0, %p41_p10  ;;  %s986_s21 = sshll.u32 %s185_s14, 3 }
  0x19   : > { %s987_s24 = sshll.u32 %s1315_s18, 3  ;;  %s189_s28 = scalar_lea.vmem [#allocation3], %s986_s21 }
  0x1a   : > { %s193_s27 = scalar_lea.hbm %s1603_s0, %s987_s24  ;;  %s197_s29 = sshll.u32 %s189_s28, 4  ;;  %s198_s29 = int_to_ptr.vmem [resolvable:$true] %s197_s29 }
  0x1b   : > { %s195_s30 = sshll.u32 %s193_s27, 4  ;;  %p1459_p7 = pnand %p1052_p2, %p1432_p11  ;;  %s196_s30 = int_to_ptr.hbm [resolvable:$true] %s195_s30 }
  0x1c   : > { %s186_s6 = scalar_lea.sflag [#allocation4], %s185_s14  ;;  %s1215_s7 = sshra.s32 %s196_s30, 4  ;;  %s1216_s7 = int_to_ptr.hbm [resolvable:$true] %s1215_s7 }
  0x1d   : > { %s1217_s9 = scalar_lea.hbm %s1216_s7, 8  ;;  %p1219_p9 = pneg %p1459_p7 }
  0x1e   : > { %p1218_p8 = scmp.ne.s32.totalorder %s1216_s7, %s1217_s9  ;;  %s1222_s24 = scalar_lea.hbm %s1603_s0, 16 }
  0x1f   : > { %p1223_p11 = scmp.lt.s32.totalorder %s1216_s7, %s1603_s0  ;;  %p1224_p0 = scmp.lt.s32.totalorder %s1222_s24, %s1217_s9 }
  0x20   : > { %p1220_p10 = pnand %p1219_p9, %p1218_p8 }
  0x21   : > { %p1225_p2 = por %p1224_p0, %p1223_p11 }
  0x22   : > { %p1221_p13 = pneg %p1220_p10 }
  0x24   : > { %p1226_p5 = pnand %p1225_p2, %p1221_p13 }
  0x26   : > { %1229 = shalt.err (!%p1226_p5)
}
  0x27   : > { %1045 = dma.hbm_to_vmem [thread:$0]  (!%p1459_p7), %s196_s30, 128, %s198_s29, %s186_s6  }
  0x28   : > { %206 = sbr.rel (%p1405_p3) target bundleno = 1025 (0x401), region = 36  ;;  %s1476_s14 = sand.u32 (!%p1405_p3), 1, %s1307_s16  }
  0x29   : > { %s989_s26 = sshll.u32 (!%p1405_p3), %s1476_s14, 3  ;;  %s209_s27 = scalar_lea.sflag (!%p1405_p3), [#allocation4], %s1476_s14 }
  0x2a   : > { %s212_s28 = scalar_lea.vmem (!%p1405_p3), [#allocation3], %s989_s26 }
  0x2d   : > { %1290 = dma.done.wait (%p1438_p12), %s209_s27, 128  }
  0x2e   : > { %1292 = vsyncadd (%p1438_p12), %s209_s27, 4294967168 }
  0x2f   : > { %1294 = dma.done.wait (%p42_p1), [#allocation7], 1024  }
  0x30   : > { %1296 = vsyncadd (%p42_p1), [#allocation7], 4294966272  ;;  %v252_v0 = vld [vmem:[#allocation6 + $0x18] sm:$0xff]  ;;  %v251_v1 = vld [vmem:[#allocation6 + $0x10] sm:$0xff]  ;;  %vm253_vm0 = vcmask 261120   ;;  %s1321_s23 = smov 84  }
  0x31   : > { %269 = vmatpush.msra.mxu0 %v252_v0  ;;  %v250_v2 = vld [vmem:[#allocation6 + $0x8] sm:$0xff]  ;;  %v249_v3 = vld [vmem:[#allocation6] sm:$0xff]  ;;  %v248_v4 = vld [vmem:[%s212_s28] sm:$0xff]  ;;  %s1322_s13 = smov 96   ;;  %s1323_s29 = smov 124   ;;  %vm281_vm1 = vcmask 31744  }
  0x32   : > { %s1324_s30 = smov 92   ;;  %s1325_s5 = smov 120   ;;  %vm307_vm2 = vcmask 64512   ;;  %vm415_vm3 = vcmask 64544   ;;  %vm486_vm4 = vcmask 97344   ;;  %vm557_vm5 = vcmask 130144  }
  0x33   : > { %270 = vmatpush.msra.mxu0 %v251_v1  ;;  %s1326_s6 = smov 88   ;;  %s1327_s7 = smov 116   ;;  %vm628_vm6 = vcmask 162944   ;;  %vm699_vm7 = vcmask 195744   ;;  %vm770_vm8 = vcmask 228544   ;;  %vm841_vm9 = vcmask 261344  }
  0x34   : > { %s1328_s9 = smov 76   ;;  %s1329_s10 = smov 80  }
  0x35   : > { %271 = vmatpush.msra.mxu0 %v250_v2  ;;  %s1330_s21 = smov 112   ;;  %s1331_s24 = smov 72  }
  0x36   : > { %s1332_s25 = smov 108   ;;  %s1333_s12 = smov 68  }
  0x37   : > { %272 = vmatpush.msra.mxu0 %v249_v3  ;;  %s1334_s27 = smov 100   ;;  %s1335_s28 = smov 104  }
  0x38   : > { %993 = vmatmul.msk.f32.vlgmr.msra.gmra.mxu0 %vm253_vm0, %v248_v4 }
  0xb5   : > { %v1491_v5 = vpop.f32.mrf.mxu0 }
  0xb6   : > { %490 = vrot.lane.b32.xlu2 %v1491_v5, %s1321_s23  ;;  %279 = vrot.lane.b32.xlu0 %v1491_v5, %s1322_s13  ;;  %v277_v6 = vmul.f32 0.5, %v1491_v5  ;;  %s1336_s23 = smov 64   ;;  %s1337_s13 = smov 56  }
  0xb8   : > { %346 = vrot.lane.b32.xlu1 %v277_v6, %s1323_s29  ;;  %s1338_s29 = smov 52  }
  0xbe   : > { %348 = vrot.lane.b32.xlu0 %v1491_v5, %s1324_s30  ;;  %417 = vrot.lane.b32.xlu2 %v277_v6, %s1325_s5  ;;  %s1339_s30 = smov 60   ;;  %s1340_s5 = smov 48  }
  0xc0   : > { %419 = vrot.lane.b32.xlu1 %v1491_v5, %s1326_s6  ;;  %s1341_s6 = smov 44  }
  0xc6   : > { %488 = vrot.lane.b32.xlu0 %v277_v6, %s1327_s7  ;;  %632 = vrot.lane.b32.xlu2 %v1491_v5, %s1328_s9  ;;  %s1342_s7 = smov 40   ;;  %s1343_s9 = smov 36  }
  0xc8   : > { %561 = vrot.lane.b32.xlu1 %v1491_v5, %s1329_s10  ;;  %s1344_s10 = smov 8  }
  0xce   : > { %559 = vrot.lane.b32.xlu0 %v277_v6, %s1330_s21  ;;  %703 = vrot.lane.b32.xlu2 %v1491_v5, %s1331_s24  ;;  %s1345_s21 = smov 16   ;;  %s1346_s24 = smov 4  }
  0xd0   : > { %630 = vrot.lane.b32.xlu1 %v277_v6, %s1332_s25  ;;  %s1347_s25 = smov 12  }
  0xd6   : > { %774 = vrot.lane.b32.xlu0 %v1491_v5, %s1333_s12  ;;  %772 = vrot.lane.b32.xlu2 %v277_v6, %s1334_s27  ;;  %s1348_s12 = smov 20   ;;  %s1349_s27 = smov 24  }
  0xd8   : > { %701 = vrot.lane.b32.xlu1 %v277_v6, %s1335_s28  ;;  %s1350_s28 = smov 28  }
  0xde   : > { %317 = vrot.lane.b32.xlu2 %v1491_v5, %s1336_s23  ;;  %s1020_s23 = sshll.u32 %s1400_s22, 3  ;;  %s877_s22 = scalar_lea.sflag [#allocation5], %s1476_s14 }
  0xe6   : > { %454 = vrot.lane.b32.xlu2 %v1491_v5, %s1337_s13 }
 0x110   : > { %v491_v7 = vpop.permute.xlu2 %490 }
 0x111   : > { %1003 = vmatpush.xpose.msk.msrb.mxu0 %vm281_vm1, %v491_v7 }
 0x118   : > { %v418_v8 = vpop.permute.xlu2 %417 }
 0x120   : > { %v633_v9 = vpop.permute.xlu2 %632 }
 0x121   : > { %1009 = vmatpush.xpose.msk.msra.mxu0 %vm281_vm1, %v633_v9 }
 0x128   : > { %v280_v10 = vpop.permute.xlu0 %279  ;;  %v704_v11 = vpop.permute.xlu2 %703 }
 0x129   : > { %994 = vmatpush.xpose.msk.msra.mxu1 %vm281_vm1, %v280_v10 }
 0x12a   : > { %v347_v12 = vpop.permute.xlu1 %346 }
 0x12c   : > { %995 = vmatmul.msk.f32.vlgmr.msra.gmra.mxu1 %vm281_vm1, %v277_v6 }
 0x130   : > { %v349_v13 = vpop.permute.xlu0 %348  ;;  %v773_v14 = vpop.permute.xlu2 %772 }
 0x131   : > { %997 = vmatpush.xpose.msk.msra.mxu3 %vm281_vm1, %v349_v13 }
 0x132   : > { %v420_v15 = vpop.permute.xlu1 %419 }
 0x133   : > { %1000 = vmatpush.xpose.msk.msrb.mxu1 %vm281_vm1, %v420_v15 }
 0x134   : > { %998 = vmatmul.msk.f32.vlgmr.msra.gmra.mxu3 %vm281_vm1, %v347_v12 }
 0x136   : > { %1001 = vmatmul.msk.f32.vlgmr.msrb.gmra.mxu1 %vm281_vm1, %v418_v8 }
 0x138   : > { %v489_v16 = vpop.permute.xlu0 %488  ;;  %v318_v17 = vpop.permute.xlu2 %317 }
 0x139   : > { %338 = vmatpush.msra.mxu2 %v318_v17  ;;  %1004 = vmatmul.msk.f32.vlgmr.msrb.gmra.mxu0 %vm281_vm1, %v489_v16 }
 0x13a   : > { %v562_v18 = vpop.permute.xlu1 %561 }
 0x13b   : > { %1006 = vmatpush.xpose.msk.msra.mxu1 %vm281_vm1, %v562_v18 }
 0x13f   : > { %1012 = vmatpush.xpose.msk.msrb.mxu1 %vm281_vm1, %v704_v11 }
 0x140   : > { %v560_v19 = vpop.permute.xlu0 %559  ;;  %v455_v20 = vpop.permute.xlu2 %454 }
 0x141   : > { %475 = vmatpush.msrb.mxu3 %v455_v20  ;;  %1007 = vmatmul.msk.f32.vlgmr.msra.gmra.mxu1 %vm281_vm1, %v560_v19 }
 0x142   : > { %v631_v21 = vpop.permute.xlu1 %630 }
 0x143   : > { %1010 = vmatmul.msk.f32.vlgmr.msra.gmra.mxu0 %vm281_vm1, %v631_v21 }
 0x148   : > { %v775_v22 = vpop.permute.xlu0 %774 }
 0x149   : > { %1015 = vmatpush.xpose.msk.msrb.mxu0 %vm281_vm1, %v775_v22 }
 0x14a   : > { %v702_v23 = vpop.permute.xlu1 %701 }
 0x14b   : > { %1013 = vmatmul.msk.f32.vlgmr.msrb.gmra.mxu1 %vm281_vm1, %v702_v23 }
 0x14c   : > { %1016 = vmatmul.msk.f32.vlgmr.msrb.gmra.mxu0 %vm281_vm1, %v773_v14 }
 0x1a9   : > { %v304_v24 = vpop.f32.mrf.mxu1 }
 0x1aa   : > { %v308_v25 = vsel %vm307_vm2, %v304_v24, -inf }
 0x1ab   : > { %309 = vmax.xlane.f32.xlu0 %v308_v25 }
 0x1b3   : > { %v442_v26 = vpop.f32.mrf.mxu1 }
 0x1b4   : > { %v445_v27 = vsel %vm307_vm2, %v442_v26, -inf }
 0x1b5   : > { %446 = vmax.xlane.f32.xlu2 %v445_v27 }
 0x1b6   : > { %v513_v28 = vpop.f32.mrf.mxu0 }
 0x1b7   : > { %v371_v29 = vpop.f32.mrf.mxu3  ;;  %v516_v30 = vsel %vm307_vm2, %v513_v28, -inf }
 0x1b8   : > { %517 = vmax.xlane.f32.xlu0 %v516_v30  ;;  %v374_v31 = vsel %vm307_vm2, %v371_v29, -inf }
 0x1b9   : > { %375 = vmax.xlane.f32.xlu1 %v374_v31 }
 0x1be   : > { %v584_v32 = vpop.f32.mrf.mxu1 }
 0x1bf   : > { %v587_v33 = vsel %vm307_vm2, %v584_v32, -inf }
 0x1c0   : > { %588 = vmax.xlane.f32.xlu2 %v587_v33  ;;  %v1530_v34 = vpop.f32.mrf.mxu0 }
 0x1c1   : > { %v658_v35 = vsel %vm307_vm2, %v1530_v34, -inf }
 0x1c8   : > { %v1535_v36 = vpop.f32.mrf.mxu1 }
 0x1c9   : > { %v1537_v37 = vpop.f32.mrf.mxu0  ;;  %v729_v38 = vsel %vm307_vm2, %v1535_v36, -inf }
 0x1ca   : > { %v800_v39 = vsel %vm307_vm2, %v1537_v37, -inf }
 0x1cc   : > { %525 = vrot.lane.b32.xlu0 %v1491_v5, %s1338_s29 }
 0x1d2   : > { %383 = vrot.lane.b32.xlu1 %v1491_v5, %s1339_s30  ;;  %s887_s30 = scalar_lea.hbm %s1607_s4, %s1020_s23 }
 0x1d8   : > { %596 = vrot.lane.b32.xlu2 %v1491_v5, %s1340_s5 }
 0x1e0   : > { %667 = vrot.lane.b32.xlu2 %v1491_v5, %s1341_s6 }
 0x1e8   : > { %738 = vrot.lane.b32.xlu2 %v1491_v5, %s1342_s7  ;;  %s247_s7 = scalar_lea.vmem [#allocation9], %s989_s26  ;;  %s1265_s26 = scalar_lea.hbm %s1607_s4, 16 }
 0x1f0   : > { %809 = vrot.lane.b32.xlu2 %v1491_v5, %s1343_s9  ;;  %s889_s9 = sshll.u32 %s247_s7, 4  ;;  %s890_s9 = int_to_ptr.vmem [resolvable:$true] %s889_s9 }
 0x1f6   : > { %659 = vmax.xlane.f32.xlu0 %v658_v35 }
 0x1fc   : > { %730 = vmax.xlane.f32.xlu1 %v729_v38 }
 0x1fe   : > { %801 = vmax.xlane.f32.xlu0 %v800_v39 }
 0x21e   : > { %v310_v40 = vpop.xlane.xlu0 %309 }
 0x21f   : > { %v311_v41 = vsub.f32 %v304_v24, %v310_v40 }
 0x221   : > { %v312_v42 = vmul.f32 1.442695, %v311_v41 }
 0x223   : > { %1123 = vpow2.f32 %v312_v42 }
 0x228   : > { %v447_v43 = vpop.xlane.xlu2 %446 }
 0x229   : > { %v1124_v44 = vpop.eup %1123  ;;  %v448_v45 = vsub.f32 %v442_v26, %v447_v43 }
 0x22a   : > { %996 = vmatmul.msk.f32.vlgmr.msra.gmra.mxu2 %vm307_vm2, %v1124_v44  ;;  %v314_v46 = vsel %vm307_vm2, %v1124_v44, 0.0 }
 0x22b   : > { %v449_v47 = vmul.f32 1.442695, %v448_v45  ;;  %315 = vadd.xlane.f32.xlu0 %v314_v46  ;;  %v518_v48 = vpop.xlane.xlu0 %517 }
 0x22c   : > { %v376_v49 = vpop.xlane.xlu1 %375  ;;  %v519_v51 = vsub.f32 %v513_v28, %v518_v48 }
 0x22d   : > { %1125 = vpow2.f32 %v449_v47  ;;  %v377_v50 = vsub.f32 %v371_v29, %v376_v49 }
 0x22e   : > { %v520_v54 = vmul.f32 1.442695, %v519_v51 }
 0x22f   : > { %v378_v52 = vmul.f32 1.442695, %v377_v50 }
 0x231   : > { %1127 = vpow2.f32 %v378_v52 }
 0x232   : > { %1129 = vpow2.f32 %v520_v54 }
 0x233   : > { %v1126_v53 = vpop.eup %1125  ;;  %v589_v55 = vpop.xlane.xlu2 %588 }
 0x234   : > { %v590_v56 = vsub.f32 %v584_v32, %v589_v55  ;;  %1002 = vmatmul.msk.f32.vlgmr.msrb.gmra.mxu3 %vm307_vm2, %v1126_v53  ;;  %v451_v57 = vsel %vm307_vm2, %v1126_v53, 0.0 }
 0x235   : > { %452 = vadd.xlane.f32.xlu2 %v451_v57 }
 0x236   : > { %v591_v58 = vmul.f32 1.442695, %v590_v56 }
 0x237   : > { %v1128_v59 = vpop.eup %1127 }
 0x238   : > { %1131 = vpow2.f32 %v591_v58  ;;  %v380_v60 = vsel %vm307_vm2, %v1128_v59, 0.0  ;;  %v1130_v62 = vpop.eup %1129  ;;  %v847_v58 = vld [vmem:[#allocation8 + $0x18] sm:$0xff] }
 0x239   : > { %381 = vadd.xlane.f32.xlu1 %v380_v60  ;;  %v522_v1 = vsel %vm307_vm2, %v1130_v62, 0.0  ;;  %867 = vmatpush.msra.mxu1 %v847_v58  ;;  %v845_v60 = vld [vmem:[#allocation8 + $0x8] sm:$0xff] }
 0x23b   : > { %v597_v61 = vpop.permute.xlu2 %596 }
 0x23c   : > { %617 = vmatpush.msra.mxu3 %v597_v61  ;;  %v844_v61 = vld [vmem:[#allocation8] sm:$0xff] }
 0x23e   : > { %v1132_v63 = vpop.eup %1131  ;;  %v526_v4 = vpop.permute.xlu0 %525 }
 0x23f   : > { %1008 = vmatmul.msk.f32.vlgmr.msra.gmra.mxu3 %vm307_vm2, %v1132_v63  ;;  %v593_v0 = vsel %vm307_vm2, %v1132_v63, 0.0 }
 0x240   : > { %594 = vadd.xlane.f32.xlu0 %v593_v0 }
 0x241   : > { %523 = vadd.xlane.f32.xlu1 %v522_v1 }
 0x243   : > { %v668_v2 = vpop.permute.xlu2 %667 }
 0x244   : > { %v384_v3 = vpop.permute.xlu1 %383 }
 0x245   : > { %404 = vmatpush.msrb.mxu2 %v384_v3 }
 0x246   : > { %999 = vmatmul.msk.f32.vlgmr.msrb.gmra.mxu2 %vm307_vm2, %v1128_v59  ;;  %v846_v59 = vld [vmem:[#allocation8 + $0x10] sm:$0xff] }
 0x247   : > { %546 = vmatpush.msra.mxu2 %v526_v4  ;;  %868 = vmatpush.msra.mxu1 %v846_v59 }
 0x249   : > { %688 = vmatpush.msrb.mxu2 %v668_v2  ;;  %869 = vmatpush.msra.mxu1 %v845_v60  ;;  %v1122_v2 = vld [vmem:[%s1606_s3] ss:$0 sm:$0xff] }
 0x24b   : > { %v739_v5 = vpop.permute.xlu2 %738  ;;  %870 = vmatpush.msra.mxu1 %v844_v61 }
 0x24c   : > { %759 = vmatpush.msrb.mxu3 %v739_v5 }
 0x24e   : > { %1005 = vmatmul.msk.f32.vlgmr.msra.gmra.mxu2 %vm307_vm2, %v1130_v62 }
 0x253   : > { %v810_v6 = vpop.permute.xlu2 %809 }
 0x254   : > { %830 = vmatpush.msra.mxu2 %v810_v6 }
 0x269   : > { %v660_v7 = vpop.xlane.xlu0 %659 }
 0x26a   : > { %v661_v8 = vsub.f32 %v1530_v34, %v660_v7 }
 0x26c   : > { %v662_v9 = vmul.f32 1.442695, %v661_v8 }
 0x26e   : > { %1133 = vpow2.f32 %v662_v9 }
 0x26f   : > { %v731_v10 = vpop.xlane.xlu1 %730 }
 0x270   : > { %v732_v11 = vsub.f32 %v1535_v36, %v731_v10 }
 0x271   : > { %v802_v12 = vpop.xlane.xlu0 %801 }
 0x272   : > { %v733_v13 = vmul.f32 1.442695, %v732_v11  ;;  %v803_v14 = vsub.f32 %v1537_v37, %v802_v12 }
 0x274   : > { %v1134_v15 = vpop.eup %1133  ;;  %1135 = vpow2.f32 %v733_v13  ;;  %v804_v16 = vmul.f32 1.442695, %v803_v14 }
 0x275   : > { %1011 = vmatmul.msk.f32.vlgmr.msrb.gmra.mxu2 %vm307_vm2, %v1134_v15  ;;  %v664_v17 = vsel %vm307_vm2, %v1134_v15, 0.0 }
 0x276   : > { %1137 = vpow2.f32 %v804_v16  ;;  %665 = vadd.xlane.f32.xlu1 %v664_v17 }
 0x27a   : > { %v1136_v18 = vpop.eup %1135 }
 0x27b   : > { %1014 = vmatmul.msk.f32.vlgmr.msrb.gmra.mxu3 %vm307_vm2, %v1136_v18  ;;  %v735_v19 = vsel %vm307_vm2, %v1136_v18, 0.0 }
 0x27c   : > { %v1138_v20 = vpop.eup %1137  ;;  %736 = vadd.xlane.f32.xlu0 %v735_v19 }
 0x27d   : > { %1017 = vmatmul.msk.f32.vlgmr.msra.gmra.mxu2 %vm307_vm2, %v1138_v20  ;;  %v806_v21 = vsel %vm307_vm2, %v1138_v20, 0.0 }
 0x27e   : > { %807 = vadd.xlane.f32.xlu1 %v806_v21 }
 0x29e   : > { %v316_v22 = vpop.xlane.xlu0 %315 }
 0x29f   : > { %1139 = vrcp.f32 %v316_v22 }
 0x2a5   : > { %v1140_v23 = vpop.eup %1139 }
 0x2a8   : > { %v453_v25 = vpop.xlane.xlu2 %452 }
 0x2a9   : > { %1141 = vrcp.f32 %v453_v25 }
 0x2ac   : > { %v382_v31 = vpop.xlane.xlu1 %381 }
 0x2ad   : > { %v340_v24 = vpop.f32.mrf.mxu2 }
 0x2ae   : > { %v344_v26 = vmul.f32 %v1140_v23, %v340_v24 }
 0x2af   : > { %v1142_v27 = vpop.eup %1141 }
 0x2b0   : > { %345 = vst.msk [vmem:[#allocation2] sm:$0xff] %vm281_vm1, %v344_v26 }
 0x2b3   : > { %v595_v30 = vpop.xlane.xlu0 %594 }
 0x2b4   : > { %1143 = vrcp.f32 %v595_v30  ;;  %v524_v35 = vpop.xlane.xlu1 %523 }
 0x2b5   : > { %1145 = vrcp.f32 %v382_v31 }
 0x2b6   : > { %1147 = vrcp.f32 %v524_v35 }
 0x2b7   : > { %v477_v28 = vpop.f32.mrf.mxu3 }
 0x2b8   : > { %v481_v29 = vmul.f32 %v1142_v27, %v477_v28 }
 0x2ba   : > { %483 = vrot.lane.b32.xlu0 %v481_v29, %s1344_s10  ;;  %v1144_v32 = vpop.eup %1143  ;;  %s891_s10 = sshll.u32 %s887_s30, 4  ;;  %s892_s10 = int_to_ptr.hbm [resolvable:$true] %s891_s10 }
 0x2bb   : > { %v1146_v36 = vpop.eup %1145 }
 0x2bc   : > { %v1148_v39 = vpop.eup %1147 }
 0x2c2   : > { %v619_v33 = vpop.f32.mrf.mxu3 }
 0x2c3   : > { %v623_v34 = vmul.f32 %v1144_v32, %v619_v33 }
 0x2c5   : > { %625 = vrot.lane.b32.xlu0 %v623_v34, %s1345_s21  ;;  %s1259_s21 = sshra.s32 %s892_s10, 4  ;;  %s1260_s21 = int_to_ptr.hbm [resolvable:$true] %s1259_s21 }
 0x2c6   : > { %p1266_p12 = scmp.lt.s32.totalorder %s1260_s21, %s1607_s4 }
 0x2c9   : > { %v406_v37 = vpop.f32.mrf.mxu2 }
 0x2ca   : > { %v410_v38 = vmul.f32 %v1146_v36, %v406_v37 }
 0x2cc   : > { %412 = vrot.lane.b32.xlu1 %v410_v38, %s1346_s24  ;;  %s1261_s24 = scalar_lea.hbm %s1260_s21, 8 }
 0x2cd   : > { %p1262_p1 = scmp.ne.s32.totalorder %s1260_s21, %s1261_s24  ;;  %p1267_p7 = scmp.lt.s32.totalorder %s1265_s26, %s1261_s24 }
 0x2cf   : > { %p1263_p3 = pnand %p1262_p1, %p1445_p4  ;;  %p1268_p8 = por %p1267_p7, %p1266_p12 }
 0x2d1   : > { %v548_v40 = vpop.f32.mrf.mxu2  ;;  %p1264_p5 = pneg %p1263_p3 }
 0x2d2   : > { %v552_v41 = vmul.f32 %v1148_v39, %v548_v40 }
 0x2d3   : > { %p1269_p9 = pnand %p1268_p8, %p1264_p5 }
 0x2d4   : > { %554 = vrot.lane.b32.xlu2 %v552_v41, %s1347_s25 }
 0x2e9   : > { %v666_v42 = vpop.xlane.xlu1 %665 }
 0x2ea   : > { %1149 = vrcp.f32 %v666_v42 }
 0x2ef   : > { %v737_v43 = vpop.xlane.xlu0 %736 }
 0x2f0   : > { %v1150_v45 = vpop.eup %1149  ;;  %1151 = vrcp.f32 %v737_v43 }
 0x2f1   : > { %v808_v44 = vpop.xlane.xlu1 %807 }
 0x2f2   : > { %1153 = vrcp.f32 %v808_v44 }
 0x2f6   : > { %v1152_v48 = vpop.eup %1151 }
 0x2f8   : > { %v690_v46 = vpop.f32.mrf.mxu2  ;;  %v1154_v51 = vpop.eup %1153 }
 0x2f9   : > { %v694_v47 = vmul.f32 %v1150_v45, %v690_v46 }
 0x2fb   : > { %696 = vrot.lane.b32.xlu1 %v694_v47, %s1348_s12 }
 0x2fe   : > { %v761_v49 = vpop.f32.mrf.mxu3 }
 0x2ff   : > { %v765_v50 = vmul.f32 %v1152_v48, %v761_v49 }
 0x300   : > { %v832_v52 = vpop.f32.mrf.mxu2 }
 0x301   : > { %v836_v53 = vmul.f32 %v1154_v51, %v832_v52  ;;  %767 = vrot.lane.b32.xlu0 %v765_v50, %s1349_s27 }
 0x303   : > { %838 = vrot.lane.b32.xlu1 %v836_v53, %s1350_s28 }
 0x32c   : > { %v484_v54 = vpop.permute.xlu0 %483 }
 0x32e   : > { %v555_v56 = vpop.permute.xlu2 %554 }
 0x337   : > { %v626_v57 = vpop.permute.xlu0 %625 }
 0x33e   : > { %v413_v55 = vpop.permute.xlu1 %412 }
 0x33f   : > { %416 = vst.msk [vmem:[#allocation2] sm:$0xff] %vm415_vm3, %v413_v55 }
 0x340   : > { %487 = vst.msk [vmem:[#allocation2] sm:$0xff] %vm486_vm4, %v484_v54 }
 0x341   : > { %558 = vst.msk [vmem:[#allocation2] sm:$0xff] %vm557_vm5, %v555_v56 }
 0x342   : > { %629 = vst.msk [vmem:[#allocation2] sm:$0xff] %vm628_vm6, %v626_v57 }
 0x36d   : > { %v697_v62 = vpop.permute.xlu1 %696 }
 0x36e   : > { %700 = vst.msk [vmem:[#allocation2] sm:$0xff] %vm699_vm7, %v697_v62 }
 0x373   : > { %v768_v63 = vpop.permute.xlu0 %767 }
 0x374   : > { %771 = vst.msk [vmem:[#allocation2] sm:$0xff] %vm770_vm8, %v768_v63 }
 0x375   : > { %v839_v0 = vpop.permute.xlu1 %838 }
 0x376   : > { %842 = vst.msk [vmem:[#allocation2] sm:$0xff] %vm841_vm9, %v839_v0 }
 0x37d   : > { %v843_v1 = vld [vmem:[#allocation2] sm:$0xff] }
 0x37e   : > { %1018 = vmatmul.msk.f32.vlgmr.msra.gmra.mxu1 %vm253_vm0, %v843_v1 }
 0x3fb   : > { %v872_v3 = vpop.f32.mrf.mxu1 }
 0x3fc   : > { %v873_v4 = vadd.f32 %v1122_v2, %v872_v3 }
 0x3fe   : > { %875 = vst.msk [vmem:[%s247_s7] sm:$0xff] %vm253_vm0, %v873_v4 }
 0x3ff   : > { %1272 = shalt.err (!%p1269_p9)
}
 0x400   : > { %1033 = dma.vmem_to_hbm [thread:$0]  (%p1445_p4), %s890_s9, 128, %s892_s10, %s877_s22  }
 0x401 PF: > { %s903_s14 = sand.u32 1, %s1303_s15   ;;  %p1614_p10 = scmp.ge.s32.totalorder %s1315_s18, 2 }
 0x402   : > { %s904_s23 = scalar_lea.sflag [#allocation5], %s903_s14 }
 0x403   : > { %p1047_p13 = pnand %p1614_p10, %p1449_p6 }
 0x405   : > { %p1048_p11 = pneg %p1047_p13 }
 0x407   : > { %1298 = dma.done.wait (%p1048_p11), %s904_s23, 128  }
 0x408   : > { %1300 = vsyncadd (%p1048_p11), %s904_s23, 4294967168  ;;  %p18_p0 = scmp.ge.s32.totalorder %s1419_s8, 4   ;;  %s1615_s15 = smov %s1307_s16 }
 0x409   : > { %s1616_s16 = smov %s1311_s17  ;;  %s1617_s17 = smov %s1430_s11 }
 0x40a   : > { %s1618_s18 = smov %s1419_s8  ;;  %20 = sbr.rel (!%p18_p0) target bundleno = 6 (0x6), region = 89 }
 0x40f   :  { %910 = vsyncpa [#allocation4], 1 }
 0x410   :  { %912 = vsyncpa [#allocation4 + $0x1], 1 }
 0x411   :  { %913 = vsyncpa [#allocation7], 1 }
 0x412   :  { %914 = vsyncpa [#allocation5], 1 }
 0x413   :  { %916 = vsyncpa [#allocation5 + $0x1], 1 }

</bundles_post_ra>
